<compile_context>
chip_gen: v5e
topology: v5e:2x2
jax: 0.10.0
libtpu: 0.0.40
codegen_flags: <defaults>
</compile_context>

<pallas_src>
import functools

import jax
import jax.numpy as jnp
from jax.experimental import pallas as pl
from jax.experimental.pallas import tpu as pltpu


_LANE = 128       # lane (last-dim) granularity; keep at 128 (see header note)
_SUBLANE = 8      # sublane (second-to-last-dim) granularity
_MIN_PARALLEL_TILE = 256   # ensure >=2 grid steps once batch >= 2*this (v7x 2 TCs)


def _round_up(n, m):
    return ((n + m - 1) // m) * m


def _qnet_kernel(in_size, x_ref, w1_ref, b1_ref, w2_ref, b2_ref, o_ref, xpad_ref):
    """One batch tile of relu(x @ W1 + b1) @ W2 + b2.

    x_ref:    (tile_b, in_size)  f32   -- unpadded feature width from HBM
    w1_ref:   (in_pad, hid_pad)  bf16  -- VMEM-resident (constant index_map)
    b1_ref:   (1, hid_pad)       f32
    w2_ref:   (hid_pad, out_pad) bf16  -- VMEM-resident
    b2_ref:   (1, out_pad)       f32
    o_ref:    (tile_b, out_pad)  f32   -- lane-dense 128-wide unmasked stores
    xpad_ref: (tile_b, in_pad)   f32   -- scratch for in-kernel lane padding
    """
    # Explicitly zero the lane padding (never rely on stale VMEM / undefined
    # pad contents), then drop the real columns into the first in_size lanes.
    xpad_ref[...] = jnp.zeros_like(xpad_ref)
    xpad_ref[:, :in_size] = x_ref[...]

    # Both dots run as native bf16 MXU passes with f32 accumulation; the
    # zero-padded lanes/rows contribute exact zeros so results are unaffected.
    x_bf = xpad_ref[...].astype(w1_ref.dtype)
    h = jnp.dot(x_bf, w1_ref[...], preferred_element_type=jnp.float32)
    h = jnp.maximum(h + b1_ref[...], 0.0)                  # bias + ReLU in f32 (VPU)
    out = jnp.dot(h.astype(w2_ref.dtype), w2_ref[...],
                  preferred_element_type=jnp.float32) + b2_ref[...]
    o_ref[...] = out.astype(o_ref.dtype)                   # lane-dense store


def prepare_params(w1, b1, w2, b2, weight_dtype=jnp.bfloat16):
    """Zero-pad parameters once to lane-friendly shapes; weights in bf16.

    w1: (in, hid), b1: (1, hid), w2: (hid, out), b2: (1, out)  ->
    padded copies with in/hid/out rounded up to multiples of 128.
    Zero padding is exact for matmul + bias + ReLU. Biases stay f32 so the
    bias add / ReLU epilogue is f32 on every TPU generation.
    """
    in_size, hid_size = w1.shape
    out_size = w2.shape[1]
    in_pad = _round_up(in_size, _LANE)
    hid_pad = _round_up(hid_size, _LANE)
    out_pad = _round_up(out_size, _LANE)

    w1p = jnp.zeros((in_pad, hid_pad), weight_dtype).at[:in_size, :hid_size].set(
        w1.astype(weight_dtype))
    b1p = jnp.zeros((1, hid_pad), jnp.float32).at[:, :hid_size].set(
        b1.astype(jnp.float32))
    w2p = jnp.zeros((hid_pad, out_pad), weight_dtype).at[:hid_size, :out_size].set(
        w2.astype(weight_dtype))
    b2p = jnp.zeros((1, out_pad), jnp.float32).at[:, :out_size].set(
        b2.astype(jnp.float32))
    return (w1p, b1p, w2p, b2p), (in_size, hid_size, out_size)


def _plan_batch_tiling(batch, target_tile_b):
    """Pick (tile_b, b_pad, n_tiles) with minimal batch padding.

    b_pad never rounds up to a full target tile (waste < 8 rows per tile), and
    large batches always get >= 2 grid steps so v7x's 2 TensorCores both get
    work under the 'parallel' dimension semantics.
    """
    b_sub = _round_up(max(batch, 1), _SUBLANE)
    n_tiles = pl.cdiv(b_sub, target_tile_b)
    if b_sub >= 2 * _MIN_PARALLEL_TILE:
        n_tiles = max(n_tiles, 2)
    tile_b = _round_up(pl.cdiv(b_sub, n_tiles), _SUBLANE)
    b_pad = n_tiles * tile_b
    return tile_b, b_pad, n_tiles


@functools.partial(jax.jit, static_argnames=("logical_sizes", "tile_b"))
def linear_qnet_forward_padded(x, padded_params, logical_sizes, tile_b=1024):
    """Fused two-layer forward. Returns the LANE-PADDED output (b_pad, out_pad).

    Consumers should slice [:B, :out_size] lazily / fuse it into the next op
    instead of paying a dedicated mem-bound pass just to drop the zero lanes.
    """
    w1p, b1p, w2p, b2p = padded_params
    in_size, _, _ = logical_sizes
    in_pad, hid_pad = w1p.shape
    out_pad = w2p.shape[1]
    assert x.shape[1] == in_size, "x feature dim must match the model input size"

    B = x.shape[0]
    tile_b, b_pad, n_tiles = _plan_batch_tiling(B, tile_b)

    # Row-pad only (feature dim stays at the real in_size). Skipped entirely
    # when the batch is already aligned (the common case, incl. the demo).
    if b_pad != B:
        x = jnp.pad(x, ((0, b_pad - B), (0, 0)))

    flops = 2 * b_pad * (in_pad * hid_pad + hid_pad * out_pad)
    bytes_accessed = (
        4 * b_pad * in_size                              # x (f32, real lanes only)
        + 2 * (in_pad * hid_pad + hid_pad * out_pad)     # bf16 weights
        + 4 * (hid_pad + out_pad)                        # f32 biases
        + 4 * b_pad * out_pad                            # f32 output
    )

    return pl.pallas_call(
        functools.partial(_qnet_kernel, in_size),
        out_shape=jax.ShapeDtypeStruct((b_pad, out_pad), jnp.float32),
        grid_spec=pltpu.PrefetchScalarGridSpec(
            num_scalar_prefetch=0,
            grid=(n_tiles,),
            in_specs=[
                # x: tiled along batch only, real (unpadded) feature width.
                pl.BlockSpec((tile_b, in_size), lambda i: (i, 0)),
                # Weights / biases: constant block index -> VMEM-resident
                # across all grid iterations.
                pl.BlockSpec((in_pad, hid_pad), lambda i: (0, 0)),
                pl.BlockSpec((1, hid_pad), lambda i: (0, 0)),
                pl.BlockSpec((hid_pad, out_pad), lambda i: (0, 0)),
                pl.BlockSpec((1, out_pad), lambda i: (0, 0)),
            ],
            out_specs=pl.BlockSpec((tile_b, out_pad), lambda i: (i, 0)),
            scratch_shapes=[pltpu.VMEM((tile_b, in_pad), jnp.float32)],
        ),
        compiler_params=pltpu.CompilerParams(
            # Batch tiles are independent -> shard across TCs (v7x megacore).
            dimension_semantics=("parallel",),
        ),
        cost_estimate=pl.CostEstimate(
            flops=flops, transcendentals=0, bytes_accessed=bytes_accessed
        ),
    )(x, w1p, b1p, w2p, b2p)


def linear_qnet_forward(x, padded_params, logical_sizes, tile_b=1024):
    """Module-compatible (B, output_size) view of the forward pass.

    Perf-sensitive callers should use linear_qnet_forward_padded directly and
    slice/fuse lazily (the slice here re-reads the padded buffer).
    """
    out_padded = linear_qnet_forward_padded(x, padded_params, logical_sizes, tile_b)
    return out_padded[: x.shape[0], : logical_sizes[2]]


def init_params(key, input_size, hidden_size, output_size, dtype=jnp.float32):
    # Mimics torch's U(-1/sqrt(fan_in), 1/sqrt(fan_in)) init for nn.Linear.
    k1, k2, k3, k4 = jax.random.split(key, 4)
    lim1 = 1.0 / (input_size ** 0.5)
    lim2 = 1.0 / (hidden_size ** 0.5)
    w1 = jax.random.uniform(k1, (input_size, hidden_size), dtype, -lim1, lim1)
    b1 = jax.random.uniform(k2, (1, hidden_size), dtype, -lim1, lim1)
    w2 = jax.random.uniform(k3, (hidden_size, output_size), dtype, -lim2, lim2)
    b2 = jax.random.uniform(k4, (1, output_size), dtype, -lim2, lim2)
    return w1, b1, w2, b2


if __name__ == "__main__":
    # Small shapes consistent with the DQN module's forward: (batch, input_size).
    # Intentionally non-aligned sizes (11 / 32 / 3) to exercise the padding path.
    # TODO(synk): torch's `.to(device)` / `.save()` are host-side concerns with no
    # kernel equivalent; only the forward math is implemented here.
    batch, input_size, hidden_size, output_size = 8, 11, 32, 3

    key = jax.random.PRNGKey(0)
    kx, kp = jax.random.split(key)
    x = jax.random.normal(kx, (batch, input_size), dtype=jnp.float32)
    w1, b1, w2, b2 = init_params(kp, input_size, hidden_size, output_size)

    padded_params, logical_sizes = prepare_params(w1, b1, w2, b2)
    out_padded = linear_qnet_forward_padded(x, padded_params, logical_sizes)
    out_padded = jax.block_until_ready(out_padded)
    out = out_padded[:batch, :output_size]   # lazy, consumer-side slice

    # Reference mirroring the kernel arithmetic: bf16 MXU operands, f32
    # accumulation, f32 bias + ReLU.
    w1b, w2b = w1.astype(jnp.bfloat16), w2.astype(jnp.bfloat16)
    h = jnp.dot(x.astype(jnp.bfloat16), w1b, preferred_element_type=jnp.float32) + b1
    h = jnp.maximum(h, 0.0)
    ref = jnp.dot(h.astype(jnp.bfloat16), w2b, preferred_element_type=jnp.float32) + b2

    assert out.shape == (batch, output_size)
    assert jnp.allclose(out, ref, atol=2e-2, rtol=2e-2), float(
        jnp.max(jnp.abs(out - ref)))

    print("KERNEL_OK")
</pallas_src>

<mosaic_0001>
module attributes {stable_mosaic.version = 11 : i64} {
  func.func @_qnet_kernel(%arg0: i32, %arg1: memref<8x11xf32, #tpu.memory_space<vmem>>, %arg2: memref<128x128xbf16, #tpu.memory_space<vmem>>, %arg3: memref<1x128xf32, #tpu.memory_space<vmem>>, %arg4: memref<128x128xbf16, #tpu.memory_space<vmem>>, %arg5: memref<1x128xf32, #tpu.memory_space<vmem>>, %arg6: memref<8x128xf32, #tpu.memory_space<vmem>>, %arg7: memref<8x128xf32, #tpu.memory_space<vmem>>) attributes {dimension_semantics = [#tpu.dimension_semantics<parallel>], iteration_bounds = array<i64: 1>, scalar_prefetch = 0 : i64, scratch_operands = 1 : i64, tpu.core_type = #tpu.core_type<tc>, window_params = [{transform_indices = @transform_0, window_bounds = array<i64: 8, 11>}, {pipeline_mode = #tpu.pipeline_mode<synchronous>, transform_indices = @transform_1, window_bounds = array<i64: 128, 128>}, {pipeline_mode = #tpu.pipeline_mode<synchronous>, transform_indices = @transform_2, window_bounds = array<i64: 1, 128>}, {pipeline_mode = #tpu.pipeline_mode<synchronous>, transform_indices = @transform_3, window_bounds = array<i64: 128, 128>}, {pipeline_mode = #tpu.pipeline_mode<synchronous>, transform_indices = @transform_4, window_bounds = array<i64: 1, 128>}, {transform_indices = @transform_5, window_bounds = array<i64: 8, 128>}]} {
    %cst = arith.constant 0.000000e+00 : f32
    %0 = vector.broadcast %cst : f32 to vector<8x128xf32>
    %c0 = arith.constant 0 : index
    %c0_0 = arith.constant 0 : index
    %1 = vector.load %arg7[%c0, %c0_0] : memref<8x128xf32, #tpu.memory_space<vmem>>, vector<8x128xf32>
    tpu.vector_store %arg7[%c0, %c0_0], %0 {strides = array<i32>} : memref<8x128xf32, #tpu.memory_space<vmem>>, vector<8x128xf32>,
    %c0_1 = arith.constant 0 : index
    %c0_2 = arith.constant 0 : index
    %2 = vector.load %arg1[%c0_1, %c0_2] : memref<8x11xf32, #tpu.memory_space<vmem>>, vector<8x11xf32>
    %c0_3 = arith.constant 0 : index
    %c0_4 = arith.constant 0 : index
    %3 = vector.load %arg7[%c0_3, %c0_4] : memref<8x128xf32, #tpu.memory_space<vmem>>, vector<8x11xf32>
    tpu.vector_store %arg7[%c0_3, %c0_4], %2 {strides = array<i32>} : memref<8x128xf32, #tpu.memory_space<vmem>>, vector<8x11xf32>,
    %c0_5 = arith.constant 0 : index
    %c0_6 = arith.constant 0 : index
    %4 = vector.load %arg7[%c0_5, %c0_6] : memref<8x128xf32, #tpu.memory_space<vmem>>, vector<8x128xf32>
    %5 = arith.truncf %4 : vector<8x128xf32> to vector<8x128xbf16>
    %c0_7 = arith.constant 0 : index
    %c0_8 = arith.constant 0 : index
    %6 = vector.load %arg2[%c0_7, %c0_8] : memref<128x128xbf16, #tpu.memory_space<vmem>>, vector<128x128xbf16>
    %cst_9 = arith.constant dense<0.000000e+00> : vector<8x128xf32>
    %7 = tpu.matmul %5, %6, %cst_9 {dimension_numbers = #tpu.dot_dimension_numbers<[1], [0], [0], [1], [0, 0, 1, 1], [], []>} : vector<8x128xbf16>, vector<128x128xbf16>, vector<8x128xf32> -> vector<8x128xf32>
    %c0_10 = arith.constant 0 : index
    %c0_11 = arith.constant 0 : index
    %8 = vector.load %arg3[%c0_10, %c0_11] : memref<1x128xf32, #tpu.memory_space<vmem>>, vector<1x128xf32>
    %9 = vector.broadcast %8 : vector<1x128xf32> to vector<8x128xf32>
    %10 = arith.addf %7, %9 : vector<8x128xf32>
    %cst_12 = arith.constant 0.000000e+00 : f32
    %11 = vector.broadcast %cst_12 : f32 to vector<8x128xf32>
    %12 = arith.maximumf %10, %11 : vector<8x128xf32>
    %13 = arith.truncf %12 : vector<8x128xf32> to vector<8x128xbf16>
    %c0_13 = arith.constant 0 : index
    %c0_14 = arith.constant 0 : index
    %14 = vector.load %arg4[%c0_13, %c0_14] : memref<128x128xbf16, #tpu.memory_space<vmem>>, vector<128x128xbf16>
    %cst_15 = arith.constant dense<0.000000e+00> : vector<8x128xf32>
    %15 = tpu.matmul %13, %14, %cst_15 {dimension_numbers = #tpu.dot_dimension_numbers<[1], [0], [0], [1], [0, 0, 1, 1], [], []>} : vector<8x128xbf16>, vector<128x128xbf16>, vector<8x128xf32> -> vector<8x128xf32>
    %c0_16 = arith.constant 0 : index
    %c0_17 = arith.constant 0 : index
    %16 = vector.load %arg5[%c0_16, %c0_17] : memref<1x128xf32, #tpu.memory_space<vmem>>, vector<1x128xf32>
    %17 = vector.broadcast %16 : vector<1x128xf32> to vector<8x128xf32>
    %18 = arith.addf %15, %17 : vector<8x128xf32>
    %c0_18 = arith.constant 0 : index
    %c0_19 = arith.constant 0 : index
    %19 = vector.load %arg6[%c0_18, %c0_19] : memref<8x128xf32, #tpu.memory_space<vmem>>, vector<8x128xf32>
    tpu.vector_store %arg6[%c0_18, %c0_19], %18 {strides = array<i32>} : memref<8x128xf32, #tpu.memory_space<vmem>>, vector<8x128xf32>,
    return
  }
  func.func @transform_0(%arg0: i32) -> (i32, i32) {
    %c0_i32 = arith.constant 0 : i32
    %c0_i32_0 = arith.constant 0 : i32
    return %arg0, %c0_i32 : i32, i32
  }
  func.func @transform_1(%arg0: i32) -> (i32, i32) {
    %c0_i32 = arith.constant 0 : i32
    %c0_i32_0 = arith.constant 0 : i32
    %c0_i32_1 = arith.constant 0 : i32
    return %c0_i32, %c0_i32_0 : i32, i32
  }
  func.func @transform_2(%arg0: i32) -> (i32, i32) {
    %c0_i32 = arith.constant 0 : i32
    %c0_i32_0 = arith.constant 0 : i32
    %c0_i32_1 = arith.constant 0 : i32
    return %c0_i32, %c0_i32_0 : i32, i32
  }
  func.func @transform_3(%arg0: i32) -> (i32, i32) {
    %c0_i32 = arith.constant 0 : i32
    %c0_i32_0 = arith.constant 0 : i32
    %c0_i32_1 = arith.constant 0 : i32
    return %c0_i32, %c0_i32_0 : i32, i32
  }
  func.func @transform_4(%arg0: i32) -> (i32, i32) {
    %c0_i32 = arith.constant 0 : i32
    %c0_i32_0 = arith.constant 0 : i32
    %c0_i32_1 = arith.constant 0 : i32
    return %c0_i32, %c0_i32_0 : i32, i32
  }
  func.func @transform_5(%arg0: i32) -> (i32, i32) {
    %c0_i32 = arith.constant 0 : i32
    %c0_i32_0 = arith.constant 0 : i32
    return %arg0, %c0_i32 : i32, i32
  }
}

</mosaic_0001>

<bundles_post_ra>
// kernel: linear_qnet_forward_padded.1
= control target key start
LH: loop header
LB: loop body
LE: loop exit
PB: predicated region body
PF: predicated region fallthrough
CT: control target
= control target key end

     0   :  { %10 = vsyncpa [#allocation4], 0  ;;  %s501_s0 = inlined_call_operand.hbm [shape: f32[8,11], index: 0, kind: input, shape index: {}]   ;;  %s502_s1 = inlined_call_operand.hbm [shape: bf16[128,128], index: 1, kind: input, shape index: {}]   ;;  %s503_s2 = inlined_call_operand.vmem [shape: f32[1,128], index: 2, kind: input, shape index: {}]   ;;  %s504_s3 = inlined_call_operand.hbm [shape: bf16[128,128], index: 3, kind: input, shape index: {}]   ;;  %s505_s4 = inlined_call_operand.vmem [shape: f32[1,128], index: 4, kind: input, shape index: {}]   ;;  %s506_s5 = inlined_call_operand.hbm [shape: f32[8,128], index: 5, kind: output, shape index: {}]  }
   0x1   :  { %11 = vsyncpa [#allocation7], 0  ;;  %s28_s20 = sshll.u32 %s502_s1, 4  ;;  %s29_s20 = int_to_ptr.hbm [resolvable:$true] %s28_s20 }
   0x2   :  { %12 = vsyncpa [#allocation5], 0  ;;  %s446_s21 = smov [#allocation6]   ;;  %s18_s25 = sshll.u32 %s501_s0, 4  ;;  %s19_s25 = int_to_ptr.hbm [resolvable:$true] %s18_s25 }
   0x3   :  { %s30_s22 = sshll.u32 %s446_s21, 4  ;;  %s447_s26 = smov 64   ;;  %s31_s22 = int_to_ptr.vmem [resolvable:$true] %s30_s22 }
   0x4   :  { %s448_s27 = smov 4   ;;  %s449_s28 = smov [#allocation3]  }
   0x5   :  { %36 = dma.hbm_to_vmem [thread:$0]  %s29_s20, 1024, %s31_s22, [#allocation7], %s447_s26, %s447_s26, %s448_s27  }
   0x6   :  { %s20_s29 = sshll.u32 %s449_s28, 4  ;;  %s43_s7 = sshll.u32 %s504_s3, 4  ;;  %s21_s29 = int_to_ptr.vmem [resolvable:$true] %s20_s29  ;;  %s44_s7 = int_to_ptr.hbm [resolvable:$true] %s43_s7 }
   0x7   :  { %23 = dma.hbm_to_vmem [thread:$0]  %s19_s25, 128, %s21_s29, [#allocation4]  }
   0x8   :  { %s450_s1 = smov [#allocation8]  }
   0x9   :  { %s45_s8 = sshll.u32 %s450_s1, 4  ;;  %s46_s8 = int_to_ptr.vmem [resolvable:$true] %s45_s8 }
   0xa   :  { %51 = dma.hbm_to_vmem [thread:$0]  %s44_s7, 1024, %s46_s8, [#allocation7], %s447_s26, %s447_s26, %s448_s27  }
   0xb   :  { %440 = dma.done.wait [#allocation4], 128  }
   0xc   :  { %441 = vsyncadd [#allocation4], 4294967168 }
   0xd   :  { %442 = dma.done.wait [#allocation7], 2048  }
   0xe   :  { %443 = vsyncadd [#allocation7], 4294965248  ;;  %v451_v0 = vmov 0.0   ;;  %v326_v1 = vld [vmem:[#allocation6 + $0x38] sm:$0xff]  ;;  %vm68_vm0 = vcmask 89088   ;;  %v325_v2 = vld [vmem:[#allocation6 + $0x30] sm:$0xff] }
   0xf   :  { %66 = vst [vmem:[#allocation2] sm:$0xff] %v451_v0  ;;  %140 = vmatpush.bf16.msra.mxu0 %v326_v1  ;;  %v67_v3 = vld [vmem:[#allocation3] sm:$0xff]  ;;  %v333_v5 = vld [vmem:[#allocation8 + $0x30] sm:$0xff]  ;;  %v324_v6 = vld [vmem:[#allocation6 + $0x28] sm:$0xff]  ;;  %s452_s11 = smov [#allocation9]   ;;  %s244_s15 = sshll.u32 %s506_s5, 4  ;;  %s245_s15 = int_to_ptr.hbm [resolvable:$true] %s244_s15 }
  0x10   :  { %69 = vst.msk [vmem:[#allocation2] sm:$0xff] %vm68_vm0, %v67_v3  ;;  %v334_v4 = vld [vmem:[#allocation8 + $0x38] sm:$0xff]  ;;  %v332_v7 = vld [vmem:[#allocation8 + $0x28] sm:$0xff]  ;;  %v323_v8 = vld [vmem:[#allocation6 + $0x20] sm:$0xff]  ;;  %s242_s12 = sshll.u32 %s452_s11, 4  ;;  %s243_s12 = int_to_ptr.vmem [resolvable:$true] %s242_s12 }
  0x11   :  { %223 = vmatpush.bf16.msra.mxu1 %v334_v4  ;;  %v331_v9 = vld [vmem:[#allocation8 + $0x20] sm:$0xff]  ;;  %v322_v10 = vld [vmem:[#allocation6 + $0x18] sm:$0xff]  ;;  %v321_v12 = vld [vmem:[#allocation6 + $0x10] sm:$0xff] }
  0x12   :  { %v330_v11 = vld [vmem:[#allocation8 + $0x18] sm:$0xff]  ;;  %v329_v13 = vld [vmem:[#allocation8 + $0x10] sm:$0xff]  ;;  %v320_v14 = vld [vmem:[#allocation6 + $0x8] sm:$0xff] }
  0x13   :  { %141 = vmatpush.bf16.msra.mxu0 %v325_v2  ;;  %v319_v15 = vld [vmem:[#allocation6] sm:$0xff]  ;;  %v328_v18 = vld [vmem:[#allocation8 + $0x8] sm:$0xff]  ;;  %v342_v20 = vld [vmem:[%s503_s2] ss:$0 sm:$0xff] }
  0x14   :  { %v327_v19 = vld [vmem:[#allocation8] sm:$0xff]  ;;  %v343_v26 = vld [vmem:[%s505_s4] ss:$0 sm:$0xff] }
  0x15   :  { %224 = vmatpush.bf16.msra.mxu1 %v333_v5 }
  0x17   :  { %142 = vmatpush.bf16.msra.mxu0 %v324_v6  ;;  %v70_v16 = vld [vmem:[#allocation2] sm:$0xff] }
  0x18   :  { %v71_v17 = vpack.c.bf16 %v70_v16, %v70_v16 }
  0x19   :  { %225 = vmatpush.bf16.msra.mxu1 %v332_v7 }
  0x1b   :  { %143 = vmatpush.bf16.msra.mxu0 %v323_v8 }
  0x1d   :  { %226 = vmatpush.bf16.msra.mxu1 %v331_v9 }
  0x1f   :  { %144 = vmatpush.bf16.msra.mxu0 %v322_v10 }
  0x21   :  { %227 = vmatpush.bf16.msra.mxu1 %v330_v11 }
  0x23   :  { %145 = vmatpush.bf16.msra.mxu0 %v321_v12 }
  0x25   :  { %228 = vmatpush.bf16.msra.mxu1 %v329_v13 }
  0x27   :  { %146 = vmatpush.bf16.msra.mxu0 %v320_v14 }
  0x29   :  { %229 = vmatpush.bf16.msra.mxu1 %v328_v18 }
  0x2b   :  { %147 = vmatpush.bf16.msra.mxu0 %v319_v15 }
  0x2d   :  { %230 = vmatpush.bf16.msra.mxu1 %v327_v19 }
  0x2e   :  { %148 = vmatmul.bf16.vlgmr.msra.gmra.mxu0 %v71_v17 }
  0xab   :  { %v149_v21 = vpop.f32.mrf.mxu0 }
  0xac   :  { %v150_v22 = vadd.f32 %v342_v20, %v149_v21 }
  0xae   :  { %v153_v23 = vmax.f32 %v150_v22, 0.0 }
  0xb0   :  { %v154_v24 = vpack.c.bf16 %v153_v23, %v153_v23 }
  0xb2   :  { %231 = vmatmul.bf16.vlgmr.msra.gmra.mxu1 %v154_v24 }
  0xb3   :  { %v151_v25 = vpop.f32.mrf.mxu0 }
 0x12f   :  { %v232_v27 = vpop.f32.mrf.mxu1 }
 0x130   :  { %v233_v28 = vadd.f32 %v343_v26, %v232_v27 }
 0x132   :  { %236 = vst [vmem:[#allocation9] sm:$0xff] %v233_v28 }
 0x133   :  { %247 = dma.vmem_to_hbm [thread:$0]  %s243_s12, 128, %s245_s15, [#allocation5]  }
 0x137   :  { %v234_v29 = vpop.f32.mrf.mxu1 }
 0x138   :  { %444 = dma.done.wait [#allocation5], 128  }
 0x139   :  { %445 = vsyncadd [#allocation5], 4294967168 }
 0x13a   :  { %252 = vsyncpa [#allocation4], 1 }
 0x13b   :  { %253 = vsyncpa [#allocation7], 1 }
 0x13c   :  { %254 = vsyncpa [#allocation5], 1 }

</bundles_post_ra>
